<compile_context>
chip_gen: v5e
topology: v5e:2x2
jax: 0.10.0
libtpu: 0.0.40
codegen_flags: <defaults>
</compile_context>

<pallas_src>
import functools

import jax
import jax.numpy as jnp
from jax.experimental import pallas as pl
from jax.experimental.pallas import tpu as pltpu


def _round_up(v, m):
    return ((v + m - 1) // m) * m


def _upconv_gemm_kernel(w_ref, b_ref, x_ref, o_ref):
    # w_ref: (tn, Cin)      resident while its block index is unchanged
    # b_ref: (tn, 1)        resident
    # x_ref: (Cin, tm)      streamed, native channels-first layout
    # o_ref: (tn, tm)       lane-dense output block
    acc = jnp.dot(w_ref[...], x_ref[...], preferred_element_type=jnp.float32)
    acc = acc + b_ref[...]                      # broadcast (tn, 1) across lanes
    o_ref[...] = jnp.maximum(acc, 0.0).astype(o_ref.dtype)


@functools.partial(jax.jit, static_argnames=("tile_m", "tile_n"))
def upconv3d(x, weight, bias, *, tile_m=512, tile_n=2048):
    """ConvTranspose3d(kernel=2, stride=2) + ReLU.

    x      : (N, Cin, D, H, W)    float32
    weight : (Cin, Cout, 2, 2, 2) float32  (PyTorch ConvTranspose3d layout)
    bias   : (Cout,)              float32
    returns: (N, Cout, 2D, 2H, 2W) float32
    """
    N, Cin, D, H, W = x.shape
    Cout = weight.shape[1]
    M = D * H * W
    ncol = 8 * Cout

    # Free reshape: x is already contiguous as (N, Cin, D*H*W). No relayout.
    x3 = x.reshape(N, Cin, M)

    # Tiny weight/bias relayouts; rows ordered (kd, kh, kw, cout).
    w_t = jnp.transpose(weight, (2, 3, 4, 1, 0)).reshape(ncol, Cin)
    b_t = jnp.tile(bias, 8).reshape(ncol, 1)

    # Lane-dense tile along M (multiple of 128); Pallas masks the tail block.
    tm = min(tile_m, _round_up(M, 128))
    tm = max(128, (tm // 128) * 128)
    # Row tile along 8*Cout (multiple of 8); single block for typical Cout.
    tn = min(tile_n, ncol)
    tn = max(8, (tn // 8) * 8)

    grid = (N, pl.cdiv(ncol, tn), pl.cdiv(M, tm))

    flops = 2 * N * ncol * Cin * M
    bytes_accessed = 4 * (N * Cin * M + ncol * Cin + ncol + N * ncol * M)

    o3 = pl.pallas_call(
        _upconv_gemm_kernel,
        out_shape=jax.ShapeDtypeStruct((N, ncol, M), x.dtype),
        grid_spec=pltpu.PrefetchScalarGridSpec(
            num_scalar_prefetch=0,
            grid=grid,
            in_specs=[
                pl.BlockSpec((tn, Cin), lambda n, j, m: (j, 0)),        # W_t
                pl.BlockSpec((tn, 1), lambda n, j, m: (j, 0)),          # bias
                pl.BlockSpec((None, Cin, tm), lambda n, j, m: (n, 0, m)),  # X stream
            ],
            out_specs=pl.BlockSpec((None, tn, tm), lambda n, j, m: (n, j, m)),
        ),
        compiler_params=pltpu.CompilerParams(
            dimension_semantics=("parallel", "parallel", "parallel"),
        ),
        cost_estimate=pl.CostEstimate(
            flops=flops, transcendentals=0, bytes_accessed=bytes_accessed),
    )(w_t, b_t, x3)

    # Interleave the 2x2x2 kernel positions into the spatial dims (NCDHW out).
    # (N, kd, kh, kw, Cout, D, H, W) -> (N, Cout, D, kd, H, kh, W, kw)
    o = o3.reshape(N, 2, 2, 2, Cout, D, H, W)
    o = jnp.transpose(o, (0, 4, 5, 1, 6, 2, 7, 3))
    return o.reshape(N, Cout, 2 * D, 2 * H, 2 * W)


def _reference_upconv3d(x, weight, bias):
    """Pure-JAX reference: same math as torch ConvTranspose3d(2, 2) + ReLU."""
    N, Cin, D, H, W = x.shape
    Cout = weight.shape[1]
    # out[n, co, 2d+kd, 2h+kh, 2w+kw] = sum_ci x[n,ci,d,h,w]*w[ci,co,kd,kh,kw] + b[co]
    o = jnp.einsum("ncdhw,coefg->nodehfwg", x, weight)
    o = o.reshape(N, Cout, 2 * D, 2 * H, 2 * W) + bias[None, :, None, None, None]
    return jnp.maximum(o, 0.0)


if __name__ == "__main__":
    key = jax.random.PRNGKey(0)
    k_x, k_w, k_b = jax.random.split(key, 3)

    # Small shapes consistent with the module: batch=2, Cin=4, Cout=8, spatial=16.
    N, Cin, Cout, D, H, W = 2, 4, 8, 16, 16, 16

    x = jax.random.normal(k_x, (N, Cin, D, H, W), dtype=jnp.float32)
    # Mimic PyTorch's uniform(-1/sqrt(fan), 1/sqrt(fan)) init scale.
    fan = Cin * 2 * 2 * 2
    bound = 1.0 / (fan ** 0.5)
    weight = jax.random.uniform(k_w, (Cin, Cout, 2, 2, 2),
                                minval=-bound, maxval=bound, dtype=jnp.float32)
    bias = jax.random.uniform(k_b, (Cout,), minval=-bound, maxval=bound,
                              dtype=jnp.float32)

    out = upconv3d(x, weight, bias)
    out = jax.block_until_ready(out)

    ref = _reference_upconv3d(x, weight, bias)
    assert out.shape == (N, Cout, 2 * D, 2 * H, 2 * W), out.shape
    assert jnp.allclose(out, ref, atol=1e-5, rtol=1e-5), "mismatch vs reference"

    print("KERNEL_OK")
</pallas_src>

<mosaic_0001>
module attributes {stable_mosaic.version = 11 : i64} {
  func.func @_upconv_gemm_kernel(%arg0: i32, %arg1: i32, %arg2: i32, %arg3: memref<64x4xf32, #tpu.memory_space<vmem>>, %arg4: memref<64x1xf32, #tpu.memory_space<vmem>>, %arg5: memref<1x4x512xf32, #tpu.memory_space<vmem>>, %arg6: memref<1x64x512xf32, #tpu.memory_space<vmem>>) attributes {dimension_semantics = [#tpu.dimension_semantics<parallel>, #tpu.dimension_semantics<parallel>, #tpu.dimension_semantics<parallel>], iteration_bounds = array<i64: 2, 1, 8>, scalar_prefetch = 0 : i64, scratch_operands = 0 : i64, tpu.core_type = #tpu.core_type<tc>, window_params = [{transform_indices = @transform_0, window_bounds = array<i64: 64, 4>}, {transform_indices = @transform_1, window_bounds = array<i64: 64, 1>}, {transform_indices = @transform_2, window_bounds = array<i64: 1, 4, 512>}, {transform_indices = @transform_3, window_bounds = array<i64: 1, 64, 512>}]} {
    %c0 = arith.constant 0 : index
    %c0_0 = arith.constant 0 : index
    %0 = vector.load %arg3[%c0, %c0_0] : memref<64x4xf32, #tpu.memory_space<vmem>>, vector<64x4xf32>
    %c0_1 = arith.constant 0 : index
    %c0_2 = arith.constant 0 : index
    %c0_3 = arith.constant 0 : index
    %1 = vector.load %arg5[%c0_1, %c0_2, %c0_3] : memref<1x4x512xf32, #tpu.memory_space<vmem>>, vector<1x4x512xf32>
    %2 = vector.shape_cast %1 : vector<1x4x512xf32> to vector<4x512xf32>
    %cst = arith.constant dense<0.000000e+00> : vector<64x512xf32>
    %3 = tpu.matmul %0, %2, %cst {dimension_numbers = #tpu.dot_dimension_numbers<[1], [0], [0], [1], [0, 0, 1, 1], [], []>} : vector<64x4xf32>, vector<4x512xf32>, vector<64x512xf32> -> vector<64x512xf32>
    %c0_4 = arith.constant 0 : index
    %c0_5 = arith.constant 0 : index
    %4 = vector.load %arg4[%c0_4, %c0_5] : memref<64x1xf32, #tpu.memory_space<vmem>>, vector<64x1xf32>
    %5 = vector.broadcast %4 : vector<64x1xf32> to vector<64x512xf32>
    %6 = arith.addf %3, %5 : vector<64x512xf32>
    %cst_6 = arith.constant 0.000000e+00 : f32
    %7 = vector.broadcast %cst_6 : f32 to vector<64x512xf32>
    %8 = arith.maximumf %6, %7 : vector<64x512xf32>
    %c0_7 = arith.constant 0 : index
    %c0_8 = arith.constant 0 : index
    %c0_9 = arith.constant 0 : index
    %9 = vector.load %arg6[%c0_7, %c0_8, %c0_9] : memref<1x64x512xf32, #tpu.memory_space<vmem>>, vector<1x64x512xf32>
    %10 = vector.shape_cast %9 : vector<1x64x512xf32> to vector<64x512xf32>
    %11 = vector.shape_cast %8 : vector<64x512xf32> to vector<1x64x512xf32>
    tpu.vector_store %arg6[%c0_7, %c0_8, %c0_9], %11 {strides = array<i32>} : memref<1x64x512xf32, #tpu.memory_space<vmem>>, vector<1x64x512xf32>,
    return
  }
  func.func @transform_0(%arg0: i32, %arg1: i32, %arg2: i32) -> (i32, i32) {
    %c0_i32 = arith.constant 0 : i32
    %c0_i32_0 = arith.constant 0 : i32
    return %arg1, %c0_i32 : i32, i32
  }
  func.func @transform_1(%arg0: i32, %arg1: i32, %arg2: i32) -> (i32, i32) {
    %c0_i32 = arith.constant 0 : i32
    %c0_i32_0 = arith.constant 0 : i32
    return %arg1, %c0_i32 : i32, i32
  }
  func.func @transform_2(%arg0: i32, %arg1: i32, %arg2: i32) -> (i32, i32, i32) {
    %c0_i32 = arith.constant 0 : i32
    %c0_i32_0 = arith.constant 0 : i32
    return %arg0, %c0_i32, %arg2 : i32, i32, i32
  }
  func.func @transform_3(%arg0: i32, %arg1: i32, %arg2: i32) -> (i32, i32, i32) {
    %c0_i32 = arith.constant 0 : i32
    return %arg0, %arg1, %arg2 : i32, i32, i32
  }
}

</mosaic_0001>

<bundles_post_ra>
// kernel: tile.0
= control target key start
LH: loop header
LB: loop body
LE: loop exit
PB: predicated region body
PF: predicated region fallthrough
CT: control target
= control target key end

     0   :  { %vm3_vm0 = vcmask 7168   ;;  %s84_s8 = smov 125   ;;  %s85_s13 = smov 123   ;;  %s167_s0 = inlined_call_operand.vmem [shape: f32[8,8], index: 0, kind: input, shape index: {}]   ;;  %s168_s1 = inlined_call_operand.vmem [shape: f32[64,1], index: 1, kind: output, shape index: {}]  }
   0x1   :  { %v6_v0 = vld [vmem:[%s167_s0] sm:$0xff]   ;;  %s83_s0 = smov 127   ;;  %s86_s14 = smov 126  }
   0x2   :  { %7 = vrot.lane.b32.xlu0 %v6_v0, %s83_s0  ;;  %23 = vrot.lane.b32.xlu1 %v6_v0, %s84_s8  ;;  %4 = vst.msk [vmem:[%s168_s1] ss:$8 sm:$0xf] %vm3_vm0, %v6_v0   ;;  %s87_s15 = smov 124   ;;  %s88_s16 = smov 122  }
   0x3   :  { %5 = vst.msk [vmem:[%s168_s1] ss:$8 sm:$0xf0] %vm3_vm0, %v6_v0   ;;  %39 = vrot.lane.b32.xlu2 %v6_v0, %s85_s13  ;;  %s89_s17 = smov 121  }
   0xa   :  { %15 = vrot.lane.b32.xlu0 %v6_v0, %s86_s14  ;;  %31 = vrot.lane.b32.xlu1 %v6_v0, %s87_s15 }
   0xb   :  { %47 = vrot.lane.b32.xlu2 %v6_v0, %s88_s16 }
  0x12   :  { %55 = vrot.lane.b32.xlu0 %v6_v0, %s89_s17 }
  0x5d   :  { %v40_v1 = vpop.permute.xlu2 %39  }
  0x5e   :  { %70 = vst.msk [vmem:[%s168_s1 + $0x5] ss:$8 sm:$0xf] %vm3_vm0, %v40_v1  }
  0x5f   :  { %71 = vst.msk [vmem:[%s168_s1 + $0x5] ss:$8 sm:$0xf0] %vm3_vm0, %v40_v1  }
  0x65   :  { %v48_v2 = vpop.permute.xlu2 %47  }
  0x66   :  { %72 = vst.msk [vmem:[%s168_s1 + $0x6] ss:$8 sm:$0xf] %vm3_vm0, %v48_v2  }
  0x67   :  { %73 = vst.msk [vmem:[%s168_s1 + $0x6] ss:$8 sm:$0xf0] %vm3_vm0, %v48_v2  }
  0x74   :  { %v8_v3 = vpop.permute.xlu0 %7   ;;  %v24_v4 = vpop.permute.xlu1 %23  }
  0x75   :  { %62 = vst.msk [vmem:[%s168_s1 + $0x1] ss:$8 sm:$0xf] %vm3_vm0, %v8_v3  }
  0x76   :  { %63 = vst.msk [vmem:[%s168_s1 + $0x1] ss:$8 sm:$0xf0] %vm3_vm0, %v8_v3  }
  0x77   :  { %66 = vst.msk [vmem:[%s168_s1 + $0x3] ss:$8 sm:$0xf] %vm3_vm0, %v24_v4  }
  0x78   :  { %67 = vst.msk [vmem:[%s168_s1 + $0x3] ss:$8 sm:$0xf0] %vm3_vm0, %v24_v4  }
  0x7c   :  { %v16_v5 = vpop.permute.xlu0 %15   ;;  %v32_v6 = vpop.permute.xlu1 %31  }
  0x7d   :  { %64 = vst.msk [vmem:[%s168_s1 + $0x2] ss:$8 sm:$0xf] %vm3_vm0, %v16_v5  }
  0x7e   :  { %65 = vst.msk [vmem:[%s168_s1 + $0x2] ss:$8 sm:$0xf0] %vm3_vm0, %v16_v5  }
  0x7f   :  { %68 = vst.msk [vmem:[%s168_s1 + $0x4] ss:$8 sm:$0xf] %vm3_vm0, %v32_v6  }
  0x80   :  { %69 = vst.msk [vmem:[%s168_s1 + $0x4] ss:$8 sm:$0xf0] %vm3_vm0, %v32_v6  }
  0x84   :  { %v56_v7 = vpop.permute.xlu0 %55  }
  0x85   :  { %74 = vst.msk [vmem:[%s168_s1 + $0x7] ss:$8 sm:$0xf] %vm3_vm0, %v56_v7  }
  0x86   :  { %75 = vst.msk [vmem:[%s168_s1 + $0x7] ss:$8 sm:$0xf0] %vm3_vm0, %v56_v7  }

// kernel: tile.8
= control target key start
LH: loop header
LB: loop body
LE: loop exit
PB: predicated region body
PF: predicated region fallthrough
CT: control target
= control target key end

     0   :  { %2 = vsyncpa [#allocation1], 0  ;;  %s48_s8 = smov [#allocation0]   ;;  %s65_s0 = inlined_call_operand.hbm [shape: f32[8], index: 0, kind: input, shape index: {}]   ;;  %s66_s1 = inlined_call_operand.vmem [shape: f32[8,8], index: 1, kind: output, shape index: {}]  }
   0x1   :  { %s8_s0 = sshll.u32 %s65_s0, 4  ;;  %s10_s9 = sshll.u32 %s48_s8, 4  ;;  %s9_s0 = int_to_ptr.hbm [resolvable:$true] %s8_s0  ;;  %s11_s9 = int_to_ptr.vmem [resolvable:$true] %s10_s9 }
   0x2   :  { %13 = dma.hbm_to_vmem [thread:$0]  %s9_s0, 16, %s11_s9, [#allocation1]  }
   0x3   :  { %46 = dma.done.wait [#allocation1], 16  }
   0x4   :  { %47 = vsyncadd [#allocation1], 4294967280  ;;  %v18_v0 = vld [vmem:[#allocation0] ss:$0 sm:$0xff] }
   0x5   :  { %19 = vst [vmem:[%s66_s1] sm:$0xff] %v18_v0 }
   0x6   :  { %20 = vsyncpa [#allocation1], 1 }

// kernel: upconv3d.1
= control target key start
LH: loop header
LB: loop body
LE: loop exit
PB: predicated region body
PF: predicated region fallthrough
CT: control target
= control target key end

     0   :  { %s969_s12 = smov 0   ;;  %s971_s13 = smov 0   ;;  %s1244_s0 = inlined_call_operand.vmem [shape: f32[64,4], index: 0, kind: input, shape index: {}]   ;;  %s1245_s1 = inlined_call_operand.vmem [shape: f32[64,1], index: 1, kind: input, shape index: {}]   ;;  %s1246_s2 = inlined_call_operand.vmem [shape: f32[2,4,4096], index: 2, kind: input, shape index: {}]   ;;  %s1247_s3 = inlined_call_operand.vmem [shape: f32[2,64,4096], index: 3, kind: output, shape index: {}]  }
   0x1   :  { %s973_s14 = smov 0   ;;  %s975_s15 = smov 0  }
   0x2   :  { %s977_s16 = smov 0   ;;  %s979_s17 = smov 0  }
   0x3   :  { %s981_s18 = smov 0  }
   0x4 LB: > { %s25_s19 = sadd.s32 1, %s938_s16  ;;  %s32_s20 = sadd.s32 1, %s942_s17  ;;  %s946_s18 = sphi %s981_s18, %s13_s18   ;;  %s942_s17 = sphi %s979_s17, %s1254_s17   ;;  %s938_s16 = sphi %s977_s16, %s1253_s16   ;;  %s934_s15 = sphi %s975_s15, %s1252_s15   ;;  %s930_s14 = sphi %s973_s14, %s1251_s14   ;;  %s926_s13 = sphi %s971_s13, %s1250_s13   ;;  %s922_s12 = sphi %s969_s12, %s1249_s12  }
   0x5   : > { %p26_p0 = scmp.ge.s32.totalorder %s25_s19, 8  ;;  %s779_s21 = sadd.s32 4294967295, %s946_s18  }
   0x6   : > { %p133_p1 = scmp.ne.s32.totalorder %s926_s13, %s922_s12  ;;  %p134_p2 = scmp.eq.s32.totalorder %s779_s21, 15 }
   0x7   : > { %s1256_s19 = smov (%p26_p0, %s25_s19), 0  ;;  %s1258_s20 = smov (!%p26_p0, %s32_s20), %s942_s17 }
   0x8   : > { %s119_s22 = ssub.s32 %s938_s16, %s1256_s19  ;;  %p34_p3 = scmp.ge.s32.totalorder %s1258_s20, 2 }
   0x9   : > { %p785_p4 = scmp.ge.s32.totalorder %s946_s18, 1  ;;  %p1013_p5 = por %p134_p2, %p133_p1 }
   0xa   : > { %p189_p6 = scmp.lt.s32.totalorder %s946_s18, 17  ;;  %s1260_s20 = smov (%p34_p3, %s1258_s20), 0 }
   0xb   : > { %s116_s24 = ssub.s32 %s942_s17, %s1260_s20  ;;  %s123_s26 = sadd.s32 1, %s926_s13 }
   0xc   : > { %p190_p7 = pnand %p785_p4, %p189_p6  ;;  %s120_s25 = sor.u32 %s119_s22, %s116_s24 }
   0xd   : > { %p121_p8 = scmp.eq.s32.totalorder %s120_s25, 0  ;;  %s1026_s28 = sshll.u32 (!%p190_p7), %s930_s14, 2 }
   0xe   : > { %193 = sbr.rel (%p190_p7) target bundleno = 243 (0xf3), region = 32  ;;  %p239_p9 = scmp.lt.s32.totalorder (!%p190_p7), %s934_s15, 1 }
   0xf   : > { %s1024_s27 = scalar_select %p121_p8, %s926_s13, %s123_s26  }
  0x10   : > { %p241_p10 = scmp.lt.s32.totalorder (!%p190_p7), %s1026_s28, 31  ;;  %s223_s10 = sand.u32 (!%p190_p7), 1, %s922_s12  }
  0x13   : > { %s240_s29 = scalar_select %p239_p9, %s934_s15, 1  ;;  %v948_v0 = vmov 0   ;;  %v260_v1 = vld [vmem:[%s1245_s1] sm:$0xff]  ;;  %v261_v4 = vld [vmem:[%s1245_s1 + $0x8] sm:$0xff]  ;;  %vm342_vm0 = vcmask 1043456   ;;  %vm317_vm1 = vcmask 31744  }
  0x14   : > { %889 = vset.pattern.permute.xlu0 %v948_v0  ;;  %890 = vset.pattern.permute.xlu1 %v948_v0  ;;  %s242_s30 = scalar_select %p241_p10, %s1026_s28, 31  ;;  %v250_v5 = vld [vmem:[%s1244_s0] sm:$0xff]  ;;  %v262_v10 = vld [vmem:[%s1245_s1 + $0x10] sm:$0xff]  ;;  %v251_v11 = vld [vmem:[%s1244_s0 + $0x8] sm:$0xff] }
  0x15   : > { %891 = vset.pattern.permute.xlu2 %v948_v0  ;;  %s788_s4 = sshll.u32 %s240_s29, 5  ;;  %270 = vperm.xlu0 %889, %v260_v1   ;;  %v263_v12 = vld [vmem:[%s1245_s1 + $0x18] sm:$0xff]  ;;  %v252_v13 = vld [vmem:[%s1244_s0 + $0x10] sm:$0xff]  ;;  %v264_v17 = vld [vmem:[%s1245_s1 + $0x20] sm:$0xff]  ;;  %s828_s12 = sshll.u32 (%p1013_p5), %s934_s15, 8 }
  0x16   : > { %s244_s7 = sadd.s32 %s788_s4, %s242_s30  ;;  %280 = vperm.xlu1 %890, %v262_v10   ;;  %v253_v14 = vld [vmem:[%s1244_s0 + $0x18] sm:$0xff]  ;;  %v266_v16 = vld [vmem:[%s1245_s1 + $0x30] sm:$0xff]  ;;  %290 = vperm.xlu2 %891, %v264_v17   ;;  %v254_v18 = vld [vmem:[%s1244_s0 + $0x20] sm:$0xff]  ;;  %s591_s21 = sadd.s32 (%p1013_p5), %s828_s12, %s1026_s28 }
  0x17   : > { %s789_s8 = sshll.u32 %s244_s7, 2  ;;  %v267_v15 = vld [vmem:[%s1245_s1 + $0x38] sm:$0xff]  ;;  %v265_v19 = vld [vmem:[%s1245_s1 + $0x28] sm:$0xff]  ;;  %v256_v21 = vld [vmem:[%s1244_s0 + $0x30] sm:$0xff]  ;;  %s829_s22 = sshll.u32 (%p1013_p5), %s591_s21, 3 }
  0x18   : > { %s246_s11 = scalar_lea.vmem %s1246_s2, %s789_s8  ;;  %v255_v20 = vld [vmem:[%s1244_s0 + $0x28] sm:$0xff]  ;;  %v257_v22 = vld [vmem:[%s1244_s0 + $0x38] sm:$0xff]  ;;  %s1159_s23 = scalar_lea.vmem (%p1013_p5), %s1247_s3, %s829_s22 }
  0x19   : > { %v258_v2 = vld [vmem:[%s246_s11] sm:$0xff]  ;;  %v259_v3 = vld [vmem:[%s246_s11 + $0x8] sm:$0xff]  ;;  %s786_s11 = sshll.u32 %s223_s10, 8 }
  0x1a   : > { %310 = vst [vmem:[#allocation1] ss:$2 sm:$0xff] %v258_v2  ;;  %s1116_s14 = scalar_lea.vmem [#allocation2], %s786_s11 }
  0x1b   : > { %312 = vst [vmem:[#allocation1 + $0x10] ss:$2 sm:$0xff] %v259_v3 }
  0x1d   : > { %275 = vperm.xlu0 %889, %v261_v4  }
  0x1e   : > { %285 = vperm.xlu1 %890, %v263_v12   ;;  %295 = vperm.xlu2 %891, %v265_v19  }
  0x21   : > { %v313_v6 = vld.sshfl [vmem:[#allocation1] sm:$0xff pattern:$0x75316420]  ;;  %v314_v7 = vld.sshfl [vmem:[#allocation1 + $0x8] sm:$0xff pattern:$0x75316420] }
  0x22   : > { %790 = vmatpush.msk.msra.mxu0 %vm342_vm0, %v313_v6  ;;  %799 = vmatpush.msk.msra.mxu1 %vm342_vm0, %v314_v7  ;;  %v315_v8 = vld.sshfl [vmem:[#allocation1 + $0x10] sm:$0xff pattern:$0x75316420]  ;;  %v316_v9 = vld.sshfl [vmem:[#allocation1 + $0x18] sm:$0xff pattern:$0x75316420] }
  0x23   : > { %808 = vmatpush.msk.msra.mxu2 %vm342_vm0, %v315_v8  ;;  %817 = vmatpush.msk.msra.mxu3 %vm342_vm0, %v316_v9 }
  0x24   : > { %791 = vmatmul.msk.f32.vlgmr.msra.gmra.mxu0 %vm317_vm1, %v250_v5  ;;  %800 = vmatmul.msk.f32.vlgmr.msra.gmra.mxu1 %vm317_vm1, %v250_v5 }
  0x25   : > { %809 = vmatmul.msk.f32.vlgmr.msra.gmra.mxu2 %vm317_vm1, %v250_v5  ;;  %818 = vmatmul.msk.f32.vlgmr.msra.gmra.mxu3 %vm317_vm1, %v250_v5 }
  0x26   : > { %305 = vperm.xlu1 %890, %v267_v15   ;;  %300 = vperm.xlu0 %889, %v266_v16  }
  0x2c   : > { %792 = vmatmul.msk.f32.gmra.mxu0 %vm317_vm1, %v251_v11  ;;  %801 = vmatmul.msk.f32.gmra.mxu1 %vm317_vm1, %v251_v11 }
  0x2d   : > { %810 = vmatmul.msk.f32.gmra.mxu2 %vm317_vm1, %v251_v11  ;;  %819 = vmatmul.msk.f32.gmra.mxu3 %vm317_vm1, %v251_v11 }
  0x34   : > { %793 = vmatmul.msk.f32.gmra.mxu0 %vm317_vm1, %v252_v13  ;;  %802 = vmatmul.msk.f32.gmra.mxu1 %vm317_vm1, %v252_v13 }
  0x35   : > { %811 = vmatmul.msk.f32.gmra.mxu2 %vm317_vm1, %v252_v13  ;;  %820 = vmatmul.msk.f32.gmra.mxu3 %vm317_vm1, %v252_v13 }
  0x3c   : > { %794 = vmatmul.msk.f32.gmra.mxu0 %vm317_vm1, %v253_v14  ;;  %803 = vmatmul.msk.f32.gmra.mxu1 %vm317_vm1, %v253_v14 }
  0x3d   : > { %812 = vmatmul.msk.f32.gmra.mxu2 %vm317_vm1, %v253_v14  ;;  %821 = vmatmul.msk.f32.gmra.mxu3 %vm317_vm1, %v253_v14 }
  0x44   : > { %795 = vmatmul.msk.f32.gmra.mxu0 %vm317_vm1, %v254_v18  ;;  %804 = vmatmul.msk.f32.gmra.mxu1 %vm317_vm1, %v254_v18 }
  0x45   : > { %813 = vmatmul.msk.f32.gmra.mxu2 %vm317_vm1, %v254_v18  ;;  %822 = vmatmul.msk.f32.gmra.mxu3 %vm317_vm1, %v254_v18 }
  0x4c   : > { %796 = vmatmul.msk.f32.gmra.mxu0 %vm317_vm1, %v255_v20  ;;  %805 = vmatmul.msk.f32.gmra.mxu1 %vm317_vm1, %v255_v20 }
  0x4d   : > { %814 = vmatmul.msk.f32.gmra.mxu2 %vm317_vm1, %v255_v20  ;;  %823 = vmatmul.msk.f32.gmra.mxu3 %vm317_vm1, %v255_v20 }
  0x54   : > { %797 = vmatmul.msk.f32.gmra.mxu0 %vm317_vm1, %v256_v21  ;;  %806 = vmatmul.msk.f32.gmra.mxu1 %vm317_vm1, %v256_v21 }
  0x55   : > { %815 = vmatmul.msk.f32.gmra.mxu2 %vm317_vm1, %v256_v21  ;;  %824 = vmatmul.msk.f32.gmra.mxu3 %vm317_vm1, %v256_v21 }
  0x5c   : > { %798 = vmatmul.msk.f32.gmra.mxu0 %vm317_vm1, %v257_v22  ;;  %807 = vmatmul.msk.f32.gmra.mxu1 %vm317_vm1, %v257_v22 }
  0x5d   : > { %816 = vmatmul.msk.f32.gmra.mxu2 %vm317_vm1, %v257_v22  ;;  %825 = vmatmul.msk.f32.gmra.mxu3 %vm317_vm1, %v257_v22 }
  0x70   : > { %v291_v5 = vpop.permute.xlu2 %290 }
  0x78   : > { %v296_v18 = vpop.permute.xlu2 %295 }
  0x87   : > { %v271_v23 = vpop.permute.xlu0 %270 }
  0x88   : > { %v281_v43 = vpop.permute.xlu1 %280 }
  0x8f   : > { %v276_v30 = vpop.permute.xlu0 %275 }
  0x90   : > { %v286_v56 = vpop.permute.xlu1 %285 }
  0xa1   : > { %v368_v24 = vpop.f32.mrf.mxu0  ;;  %v409_v25 = vpop.f32.mrf.mxu1 }
  0xa2   : > { %v369_v26 = vadd.f32 %v368_v24, %v271_v23  ;;  %v410_v27 = vadd.f32 %v409_v25, %v271_v23 }
  0xa4   : > { %v515_v28 = vmax.f32 %v369_v26, 0.0  ;;  %v516_v29 = vmax.f32 %v410_v27, 0.0 }
  0xa6   : > { %547 = vst [vmem:[%s1116_s14] sm:$0xff] %v515_v28 }
  0xa7   : > { %548 = vst [vmem:[%s1116_s14 + $0x8] sm:$0xff] %v516_v29 }
  0xa8   : > { %v450_v31 = vpop.f32.mrf.mxu2  ;;  %v491_v32 = vpop.f32.mrf.mxu3 }
  0xa9   : > { %v451_v33 = vadd.f32 %v450_v31, %v271_v23  ;;  %v492_v34 = vadd.f32 %v491_v32, %v271_v23  ;;  %v371_v35 = vpop.f32.mrf.mxu0  ;;  %v412_v36 = vpop.f32.mrf.mxu1 }
  0xaa   : > { %v372_v37 = vadd.f32 %v371_v35, %v276_v30  ;;  %v413_v38 = vadd.f32 %v412_v36, %v276_v30  ;;  %v301_v31 = vpop.permute.xlu0 %300 }
  0xab   : > { %v517_v39 = vmax.f32 %v451_v33, 0.0  ;;  %v518_v40 = vmax.f32 %v492_v34, 0.0 }
  0xac   : > { %v519_v41 = vmax.f32 %v372_v37, 0.0  ;;  %v520_v42 = vmax.f32 %v413_v38, 0.0 }
  0xad   : > { %549 = vst [vmem:[%s1116_s14 + $0x10] sm:$0xff] %v517_v39 }
  0xae   : > { %550 = vst [vmem:[%s1116_s14 + $0x18] sm:$0xff] %v518_v40 }
  0xaf   : > { %551 = vst [vmem:[%s1116_s14 + $0x20] sm:$0xff] %v519_v41 }
  0xb0   : > { %552 = vst [vmem:[%s1116_s14 + $0x28] sm:$0xff] %v520_v42  ;;  %v453_v44 = vpop.f32.mrf.mxu2  ;;  %v494_v45 = vpop.f32.mrf.mxu3 }
  0xb1   : > { %v454_v46 = vadd.f32 %v453_v44, %v276_v30  ;;  %v495_v47 = vadd.f32 %v494_v45, %v276_v30  ;;  %v374_v48 = vpop.f32.mrf.mxu0  ;;  %v415_v49 = vpop.f32.mrf.mxu1 }
  0xb2   : > { %v375_v50 = vadd.f32 %v374_v48, %v281_v43  ;;  %v416_v51 = vadd.f32 %v415_v49, %v281_v43  ;;  %v306_v44 = vpop.permute.xlu1 %305 }
  0xb3   : > { %v521_v52 = vmax.f32 %v454_v46, 0.0  ;;  %v522_v53 = vmax.f32 %v495_v47, 0.0 }
  0xb4   : > { %v523_v54 = vmax.f32 %v375_v50, 0.0  ;;  %v524_v55 = vmax.f32 %v416_v51, 0.0 }
  0xb5   : > { %553 = vst [vmem:[%s1116_s14 + $0x30] sm:$0xff] %v521_v52 }
  0xb6   : > { %554 = vst [vmem:[%s1116_s14 + $0x38] sm:$0xff] %v522_v53 }
  0xb7   : > { %555 = vst [vmem:[%s1116_s14 + $0x40] sm:$0xff] %v523_v54 }
  0xb8   : > { %556 = vst [vmem:[%s1116_s14 + $0x48] sm:$0xff] %v524_v55  ;;  %v456_v57 = vpop.f32.mrf.mxu2  ;;  %v497_v58 = vpop.f32.mrf.mxu3 }
  0xb9   : > { %v457_v59 = vadd.f32 %v456_v57, %v281_v43  ;;  %v498_v60 = vadd.f32 %v497_v58, %v281_v43  ;;  %v377_v61 = vpop.f32.mrf.mxu0  ;;  %v418_v62 = vpop.f32.mrf.mxu1 }
  0xba   : > { %v378_v63 = vadd.f32 %v377_v61, %v286_v56  ;;  %v419_v0 = vadd.f32 %v418_v62, %v286_v56 }
  0xbb   : > { %v525_v1 = vmax.f32 %v457_v59, 0.0  ;;  %v526_v2 = vmax.f32 %v498_v60, 0.0 }
  0xbc   : > { %v527_v3 = vmax.f32 %v378_v63, 0.0  ;;  %v528_v4 = vmax.f32 %v419_v0, 0.0  ;;  %v606_v63 = vld [vmem:[%s1116_s14] sm:$0xff] (%p1013_p5)  ;;  %v608_v0 = vld [vmem:[%s1116_s14 + $0x8] sm:$0xff] (%p1013_p5) }
  0xbd   : > { %557 = vst [vmem:[%s1116_s14 + $0x50] sm:$0xff] %v525_v1  ;;  %v610_v1 = vld [vmem:[%s1116_s14 + $0x10] sm:$0xff] (%p1013_p5) }
  0xbe   : > { %558 = vst [vmem:[%s1116_s14 + $0x58] sm:$0xff] %v526_v2  ;;  %v612_v2 = vld [vmem:[%s1116_s14 + $0x18] sm:$0xff] (%p1013_p5) }
  0xbf   : > { %559 = vst [vmem:[%s1116_s14 + $0x60] sm:$0xff] %v527_v3  ;;  %v614_v3 = vld [vmem:[%s1116_s14 + $0x20] sm:$0xff] (%p1013_p5) }
  0xc0   : > { %560 = vst [vmem:[%s1116_s14 + $0x68] sm:$0xff] %v528_v4  ;;  %v459_v6 = vpop.f32.mrf.mxu2  ;;  %v500_v7 = vpop.f32.mrf.mxu3  ;;  %v616_v4 = vld [vmem:[%s1116_s14 + $0x28] sm:$0xff] (%p1013_p5) }
  0xc1   : > { %v460_v8 = vadd.f32 %v459_v6, %v286_v56  ;;  %v501_v9 = vadd.f32 %v500_v7, %v286_v56  ;;  %v380_v10 = vpop.f32.mrf.mxu0  ;;  %v421_v11 = vpop.f32.mrf.mxu1  ;;  %607 = vst [vmem:[%s1159_s23] sm:$0xff] (%p1013_p5), %v606_v63  ;;  %v620_v6 = vld [vmem:[%s1116_s14 + $0x38] sm:$0xff] (%p1013_p5)  ;;  %v622_v7 = vld [vmem:[%s1116_s14 + $0x40] sm:$0xff] (%p1013_p5) }
  0xc2   : > { %v381_v12 = vadd.f32 %v380_v10, %v291_v5  ;;  %v422_v13 = vadd.f32 %v421_v11, %v291_v5  ;;  %609 = vst [vmem:[%s1159_s23 + $0x8] sm:$0xff] (%p1013_p5), %v608_v0 }
  0xc3   : > { %v529_v14 = vmax.f32 %v460_v8, 0.0  ;;  %v530_v15 = vmax.f32 %v501_v9, 0.0  ;;  %611 = vst [vmem:[%s1159_s23 + $0x10] sm:$0xff] (%p1013_p5), %v610_v1  ;;  %v624_v8 = vld [vmem:[%s1116_s14 + $0x48] sm:$0xff] (%p1013_p5) }
  0xc4   : > { %v531_v16 = vmax.f32 %v381_v12, 0.0  ;;  %v532_v17 = vmax.f32 %v422_v13, 0.0  ;;  %613 = vst [vmem:[%s1159_s23 + $0x18] sm:$0xff] (%p1013_p5), %v612_v2  ;;  %v626_v9 = vld [vmem:[%s1116_s14 + $0x50] sm:$0xff] (%p1013_p5) }
  0xc5   : > { %561 = vst [vmem:[%s1116_s14 + $0x70] sm:$0xff] %v529_v14  ;;  %v628_v10 = vld [vmem:[%s1116_s14 + $0x58] sm:$0xff] (%p1013_p5) }
  0xc6   : > { %562 = vst [vmem:[%s1116_s14 + $0x78] sm:$0xff] %v530_v15  ;;  %v630_v11 = vld [vmem:[%s1116_s14 + $0x60] sm:$0xff] (%p1013_p5) }
  0xc7   : > { %563 = vst [vmem:[%s1116_s14 + $0x80] sm:$0xff] %v531_v16  ;;  %v632_v12 = vld [vmem:[%s1116_s14 + $0x68] sm:$0xff] (%p1013_p5) }
  0xc8   : > { %564 = vst [vmem:[%s1116_s14 + $0x88] sm:$0xff] %v532_v17  ;;  %v462_v19 = vpop.f32.mrf.mxu2  ;;  %v503_v20 = vpop.f32.mrf.mxu3 }
  0xc9   : > { %v463_v21 = vadd.f32 %v462_v19, %v291_v5  ;;  %v504_v22 = vadd.f32 %v503_v20, %v291_v5  ;;  %v383_v23 = vpop.f32.mrf.mxu0  ;;  %v424_v24 = vpop.f32.mrf.mxu1  ;;  %v618_v5 = vld [vmem:[%s1116_s14 + $0x30] sm:$0xff] (%p1013_p5)  ;;  %615 = vst [vmem:[%s1159_s23 + $0x100] sm:$0xff] (%p1013_p5), %v614_v3 }
  0xca   : > { %v384_v25 = vadd.f32 %v383_v23, %v296_v18  ;;  %v425_v26 = vadd.f32 %v424_v24, %v296_v18  ;;  %617 = vst [vmem:[%s1159_s23 + $0x108] sm:$0xff] (%p1013_p5), %v616_v4 }
  0xcb   : > { %v533_v27 = vmax.f32 %v463_v21, 0.0  ;;  %v534_v28 = vmax.f32 %v504_v22, 0.0  ;;  %619 = vst [vmem:[%s1159_s23 + $0x110] sm:$0xff] (%p1013_p5), %v618_v5 }
  0xcc   : > { %v535_v29 = vmax.f32 %v384_v25, 0.0  ;;  %v536_v30 = vmax.f32 %v425_v26, 0.0  ;;  %621 = vst [vmem:[%s1159_s23 + $0x118] sm:$0xff] (%p1013_p5), %v620_v6  ;;  %v634_v13 = vld [vmem:[%s1116_s14 + $0x70] sm:$0xff] (%p1013_p5) }
  0xcd   : > { %565 = vst [vmem:[%s1116_s14 + $0x90] sm:$0xff] %v533_v27  ;;  %v636_v14 = vld [vmem:[%s1116_s14 + $0x78] sm:$0xff] (%p1013_p5) }
  0xce   : > { %566 = vst [vmem:[%s1116_s14 + $0x98] sm:$0xff] %v534_v28  ;;  %v638_v15 = vld [vmem:[%s1116_s14 + $0x80] sm:$0xff] (%p1013_p5) }
  0xcf   : > { %567 = vst [vmem:[%s1116_s14 + $0xa0] sm:$0xff] %v535_v29  ;;  %v640_v16 = vld [vmem:[%s1116_s14 + $0x88] sm:$0xff] (%p1013_p5) }
  0xd0   : > { %568 = vst [vmem:[%s1116_s14 + $0xa8] sm:$0xff] %v536_v30  ;;  %v465_v32 = vpop.f32.mrf.mxu2  ;;  %v506_v33 = vpop.f32.mrf.mxu3 }
  0xd1   : > { %v466_v34 = vadd.f32 %v465_v32, %v296_v18  ;;  %v507_v35 = vadd.f32 %v506_v33, %v296_v18  ;;  %v386_v36 = vpop.f32.mrf.mxu0  ;;  %v427_v37 = vpop.f32.mrf.mxu1  ;;  %623 = vst [vmem:[%s1159_s23 + $0x200] sm:$0xff] (%p1013_p5), %v622_v7 }
  0xd2   : > { %v387_v38 = vadd.f32 %v386_v36, %v301_v31  ;;  %v428_v39 = vadd.f32 %v427_v37, %v301_v31  ;;  %625 = vst [vmem:[%s1159_s23 + $0x208] sm:$0xff] (%p1013_p5), %v624_v8 }
  0xd3   : > { %v537_v40 = vmax.f32 %v466_v34, 0.0  ;;  %v538_v41 = vmax.f32 %v507_v35, 0.0  ;;  %627 = vst [vmem:[%s1159_s23 + $0x210] sm:$0xff] (%p1013_p5), %v626_v9 }
  0xd4   : > { %v539_v42 = vmax.f32 %v387_v38, 0.0  ;;  %v540_v43 = vmax.f32 %v428_v39, 0.0  ;;  %629 = vst [vmem:[%s1159_s23 + $0x218] sm:$0xff] (%p1013_p5), %v628_v10  ;;  %v642_v17 = vld [vmem:[%s1116_s14 + $0x90] sm:$0xff] (%p1013_p5) }
  0xd5   : > { %569 = vst [vmem:[%s1116_s14 + $0xb0] sm:$0xff] %v537_v40  ;;  %v644_v18 = vld [vmem:[%s1116_s14 + $0x98] sm:$0xff] (%p1013_p5) }
  0xd6   : > { %570 = vst [vmem:[%s1116_s14 + $0xb8] sm:$0xff] %v538_v41  ;;  %v646_v19 = vld [vmem:[%s1116_s14 + $0xa0] sm:$0xff] (%p1013_p5) }
  0xd7   : > { %571 = vst [vmem:[%s1116_s14 + $0xc0] sm:$0xff] %v539_v42  ;;  %v648_v20 = vld [vmem:[%s1116_s14 + $0xa8] sm:$0xff] (%p1013_p5) }
  0xd8   : > { %572 = vst [vmem:[%s1116_s14 + $0xc8] sm:$0xff] %v540_v43  ;;  %v468_v45 = vpop.f32.mrf.mxu2  ;;  %v509_v46 = vpop.f32.mrf.mxu3 }
  0xd9   : > { %v469_v47 = vadd.f32 %v468_v45, %v301_v31  ;;  %v510_v48 = vadd.f32 %v509_v46, %v301_v31  ;;  %v389_v49 = vpop.f32.mrf.mxu0  ;;  %v430_v50 = vpop.f32.mrf.mxu1  ;;  %631 = vst [vmem:[%s1159_s23 + $0x300] sm:$0xff] (%p1013_p5), %v630_v11 }
  0xda   : > { %v390_v51 = vadd.f32 %v389_v49, %v306_v44  ;;  %v431_v52 = vadd.f32 %v430_v50, %v306_v44  ;;  %633 = vst [vmem:[%s1159_s23 + $0x308] sm:$0xff] (%p1013_p5), %v632_v12 }
  0xdb   : > { %v541_v53 = vmax.f32 %v469_v47, 0.0  ;;  %v542_v54 = vmax.f32 %v510_v48, 0.0  ;;  %635 = vst [vmem:[%s1159_s23 + $0x310] sm:$0xff] (%p1013_p5), %v634_v13 }
  0xdc   : > { %v543_v55 = vmax.f32 %v390_v51, 0.0  ;;  %v544_v56 = vmax.f32 %v431_v52, 0.0  ;;  %637 = vst [vmem:[%s1159_s23 + $0x318] sm:$0xff] (%p1013_p5), %v636_v14  ;;  %v650_v21 = vld [vmem:[%s1116_s14 + $0xb0] sm:$0xff] (%p1013_p5) }
  0xdd   : > { %573 = vst [vmem:[%s1116_s14 + $0xd0] sm:$0xff] %v541_v53  ;;  %v652_v22 = vld [vmem:[%s1116_s14 + $0xb8] sm:$0xff] (%p1013_p5) }
  0xde   : > { %574 = vst [vmem:[%s1116_s14 + $0xd8] sm:$0xff] %v542_v54  ;;  %v654_v23 = vld [vmem:[%s1116_s14 + $0xc0] sm:$0xff] (%p1013_p5) }
  0xdf   : > { %575 = vst [vmem:[%s1116_s14 + $0xe0] sm:$0xff] %v543_v55  ;;  %v656_v24 = vld [vmem:[%s1116_s14 + $0xc8] sm:$0xff] (%p1013_p5) }
  0xe0   : > { %576 = vst [vmem:[%s1116_s14 + $0xe8] sm:$0xff] %v544_v56  ;;  %v471_v57 = vpop.f32.mrf.mxu2  ;;  %v512_v58 = vpop.f32.mrf.mxu3 }
  0xe1   : > { %v472_v59 = vadd.f32 %v471_v57, %v306_v44  ;;  %v513_v60 = vadd.f32 %v512_v58, %v306_v44  ;;  %639 = vst [vmem:[%s1159_s23 + $0x400] sm:$0xff] (%p1013_p5), %v638_v15 }
  0xe2   : > { %585 = sbr.rel (!%p1013_p5) target bundleno = 243 (0xf3), region = 36  ;;  %641 = vst [vmem:[%s1159_s23 + $0x408] sm:$0xff] (%p1013_p5), %v640_v16 }
  0xe3   : > { %v545_v61 = vmax.f32 %v472_v59, 0.0  ;;  %v546_v62 = vmax.f32 %v513_v60, 0.0  ;;  %643 = vst [vmem:[%s1159_s23 + $0x410] sm:$0xff] (%p1013_p5), %v642_v17 }
  0xe4   : > { %645 = vst [vmem:[%s1159_s23 + $0x418] sm:$0xff] (%p1013_p5), %v644_v18  ;;  %v658_v25 = vld [vmem:[%s1116_s14 + $0xd0] sm:$0xff] (%p1013_p5) }
  0xe5   : > { %577 = vst [vmem:[%s1116_s14 + $0xf0] sm:$0xff] %v545_v61  ;;  %v660_v26 = vld [vmem:[%s1116_s14 + $0xd8] sm:$0xff] (%p1013_p5) }
  0xe6   : > { %578 = vst [vmem:[%s1116_s14 + $0xf8] sm:$0xff] %v546_v62  ;;  %v662_v27 = vld [vmem:[%s1116_s14 + $0xe0] sm:$0xff] (%p1013_p5) }
  0xe7   : > { %647 = vst [vmem:[%s1159_s23 + $0x500] sm:$0xff] %v646_v19  ;;  %v664_v28 = vld [vmem:[%s1116_s14 + $0xe8] sm:$0xff] }
  0xe8   : > { %649 = vst [vmem:[%s1159_s23 + $0x508] sm:$0xff] %v648_v20 }
  0xe9   : > { %651 = vst [vmem:[%s1159_s23 + $0x510] sm:$0xff] %v650_v21 }
  0xea   : > { %653 = vst [vmem:[%s1159_s23 + $0x518] sm:$0xff] %v652_v22 }
  0xeb   : > { %655 = vst [vmem:[%s1159_s23 + $0x600] sm:$0xff] %v654_v23 }
  0xec   : > { %657 = vst [vmem:[%s1159_s23 + $0x608] sm:$0xff] %v656_v24  ;;  %v666_v29 = vld [vmem:[%s1116_s14 + $0xf0] sm:$0xff] }
  0xed   : > { %659 = vst [vmem:[%s1159_s23 + $0x610] sm:$0xff] %v658_v25  ;;  %v668_v30 = vld [vmem:[%s1116_s14 + $0xf8] sm:$0xff] }
  0xee   : > { %661 = vst [vmem:[%s1159_s23 + $0x618] sm:$0xff] %v660_v26 }
  0xef   : > { %663 = vst [vmem:[%s1159_s23 + $0x700] sm:$0xff] %v662_v27 }
  0xf0   : > { %665 = vst [vmem:[%s1159_s23 + $0x708] sm:$0xff] %v664_v28 }
  0xf1   : > { %667 = vst [vmem:[%s1159_s23 + $0x710] sm:$0xff] %v666_v29 }
  0xf2   : > { %669 = vst [vmem:[%s1159_s23 + $0x718] sm:$0xff] %v668_v30 }
  0xf3 PF: > { %s13_s18 = sadd.s32 1, %s946_s18   ;;  %s1249_s12 = smov %s926_s13 }
  0xf4   : > { %p10_p11 = scmp.ge.s32.totalorder %s13_s18, 18   ;;  %s1250_s13 = smov %s1024_s27 }
  0xf5   : > { %s1251_s14 = smov %s938_s16  ;;  %s1252_s15 = smov %s942_s17 }
  0xf6   : > { %s1253_s16 = smov %s1256_s19  ;;  %s1254_s17 = smov %s1260_s20 }
  0xf7   :  { %12 = sbr.rel (!%p10_p11) target bundleno = 4 (0x4), region = 92 }

</bundles_post_ra>
